<compile_context>
chip_gen: v5e
topology: v5e:2x2
jax: 0.10.0
libtpu: 0.0.40
codegen_flags: <defaults>
</compile_context>

<pallas_src>
import functools

import jax
import jax.numpy as jnp
from jax.experimental import pallas as pl
from jax.experimental.pallas import tpu as pltpu


def wordvec_kernel(in_ref, ctx_ref, loss_ref, *, num_pos, e_chunks):
    # in_ref  : [E_pad, TB]      input-word embeddings, batch on the 128-lane axis
    # ctx_ref : [E_pad, S, TB]   concatenated pos(+)/neg(-) context embeddings
    # loss_ref: [1, TB]          per-example loss (lane-dense f32 store)
    S = ctx_ref.shape[1]
    TB = ctx_ref.shape[2]

    # Dot over E as a chunked (8-sublane) f32 accumulation: keeps the live set to one
    # [8,S,TB] chunk + the [S,TB] accumulator instead of a full [E,S,TB] product temp.
    scores = jnp.zeros((S, TB), jnp.float32)
    for c in range(e_chunks):
        ctx_blk = ctx_ref[pl.ds(c * 8, 8)].astype(jnp.float32)   # [8, S, TB]
        in_blk = in_ref[pl.ds(c * 8, 8)].astype(jnp.float32)     # [8, TB]
        scores = scores + jnp.sum(ctx_blk * in_blk[:, None, :], axis=0)

    # +score for the first num_pos rows (positives), -score for the rest (negatives).
    row = jax.lax.broadcasted_iota(jnp.int32, (S, TB), 0)
    signed = jnp.where(row < num_pos, scores, -scores)

    # Numerically stable logsigmoid(x) = min(x, 0) - log1p(exp(-|x|))   (EUP exp/log)
    logsig = jnp.minimum(signed, 0.0) - jnp.log1p(jnp.exp(-jnp.abs(signed)))
    loss_ref[...] = -jnp.sum(logsig, axis=0, keepdims=True)      # [1, TB]


def _vmem_limit_bytes():
    """One number used both as the tile-sizing budget and the compiler vmem limit."""
    try:
        cap = pltpu.get_tpu_info().vmem_capacity_bytes
    except Exception:  # conservative (v7x-sized) fallback if the query is unavailable
        cap = 64 * 1024 * 1024
    # Leave headroom below physical VMEM for compiler temps / double-buffer overshoot:
    # 128 MiB parts (v5e/v6e) -> 96 MiB, 64 MiB parts (v7x) -> 48 MiB.
    return int(min(cap * 3 // 4, 96 * 1024 * 1024))


def wordvec_loss(in_embed_w, out_embed_w, input_labels, pos_labels, neg_labels,
                 *, compute_dtype=jnp.bfloat16, block_b=None):
    """Forward pass of WordVec as a Pallas kernel.

    in_embed_w, out_embed_w : [V, E] float32 embedding tables
    input_labels            : [B]     int32
    pos_labels              : [B, P]  int32
    neg_labels              : [B, N]  int32
    returns                 : [B]     float32 loss per example

    Note: like jnp.take with its default mode, out-of-range labels are clamped rather
    than raising (PyTorch's nn.Embedding would error).
    """
    V, E = in_embed_w.shape
    B = input_labels.shape[0]
    P = pos_labels.shape[1]
    N = neg_labels.shape[1]
    S = P + N
    E_pad = pl.cdiv(E, 8) * 8
    itemsize = jnp.dtype(compute_dtype).itemsize

    # ---- glue: contiguous row-gathers producing lane-major slabs ---------------------
    # Only the gathered [B,S,E] slab is cast + transposed (never the full V x E table).
    # TODO(synk): fuse this gather into the kernel via memory_space=pl.ANY +
    # scalar-prefetched labels + manual async-copy row DMAs to kill the HBM round-trip.
    all_labels = jnp.concatenate([pos_labels, neg_labels], axis=1)          # [B, S]
    ctx = jnp.take(out_embed_w, all_labels, axis=0).astype(compute_dtype)   # [B, S, E]
    ctx_t = jnp.transpose(ctx, (2, 1, 0))                                   # [E, S, B]
    in_t = jnp.take(in_embed_w, input_labels, axis=0).astype(compute_dtype).T  # [E, B]

    # ---- tile sizing: budget == vmem limit, derived from the actual chip -------------
    vmem_limit = _vmem_limit_bytes()
    per_lane = (2 * E_pad * (S + 1) * itemsize   # double-buffered ctx + in input blocks
                + 2 * 8 * S * 4                  # one f32 8-row chunk + its product temp
                + 8 * S * 4                      # scores accumulator + elementwise temps
                + 16)                            # output + slack
    tb_budget = (vmem_limit // per_lane) // 128 * 128
    if tb_budget < 128:
        raise ValueError(
            f"context block too large for VMEM: a 128-wide batch tile needs about "
            f"{per_lane * 128} bytes but the limit is {vmem_limit} bytes "
            f"(S={S}, E={E})")
    if block_b is None:
        tb = min(tb_budget, 512, pl.cdiv(B, 128) * 128)   # 512 cap: avoid vreg spills
    else:
        tb = min(block_b, tb_budget)
    # v7x has two TensorCores; give the "parallel" batch grid >= 2 steps when possible
    # (harmless single extra step on 1-TC v5e/v6e).
    if B > 128 and pl.cdiv(B, tb) < 2:
        tb = max(128, pl.cdiv(pl.cdiv(B, 2), 128) * 128)
    b_pad = pl.cdiv(B, tb) * tb

    if E_pad != E or b_pad != B:
        ctx_t = jnp.pad(ctx_t, ((0, E_pad - E), (0, 0), (0, b_pad - B)))
        in_t = jnp.pad(in_t, ((0, E_pad - E), (0, b_pad - B)))

    grid = (b_pad // tb,)
    kernel = functools.partial(wordvec_kernel, num_pos=P, e_chunks=E_pad // 8)

    cost = pl.CostEstimate(
        flops=2 * b_pad * S * E_pad,                          # mul + add per (b, s, e)
        transcendentals=2 * b_pad * S,                        # exp + log1p per score
        bytes_accessed=b_pad * (S + 1) * E_pad * itemsize + b_pad * 4,
    )

    out = pl.pallas_call(
        kernel,
        out_shape=jax.ShapeDtypeStruct((1, b_pad), jnp.float32),
        grid=grid,
        in_specs=[
            pl.BlockSpec((E_pad, tb), lambda i: (0, i)),          # input embed [E, TB]
            pl.BlockSpec((E_pad, S, tb), lambda i: (0, 0, i)),    # ctx embeds [E, S, TB]
        ],
        out_specs=pl.BlockSpec((1, tb), lambda i: (0, i)),        # lane-dense loss
        compiler_params=pltpu.CompilerParams(
            dimension_semantics=("parallel",),
            vmem_limit_bytes=vmem_limit,
        ),
        cost_estimate=cost,
    )(in_t, ctx_t)

    return out[0, :B]


def wordvec_loss_ref(in_embed_w, out_embed_w, input_labels, pos_labels, neg_labels,
                     cast_dtype=None):
    """Pure-JAX reference mirroring the PyTorch forward.

    If cast_dtype is set, the gathered embeddings are quantized the same way the
    kernel's compute_dtype feed is, so kernel vs reference can be compared tightly.
    """
    in_emb = jnp.take(in_embed_w, input_labels, axis=0)        # [B, E]
    pos_emb = jnp.take(out_embed_w, pos_labels, axis=0)        # [B, P, E]
    neg_emb = jnp.take(out_embed_w, neg_labels, axis=0)        # [B, N, E]
    if cast_dtype is not None:
        in_emb = in_emb.astype(cast_dtype).astype(jnp.float32)
        pos_emb = pos_emb.astype(cast_dtype).astype(jnp.float32)
        neg_emb = neg_emb.astype(cast_dtype).astype(jnp.float32)
    pos_dot = jnp.einsum("bpe,be->bp", pos_emb, in_emb)
    neg_dot = jnp.einsum("bne,be->bn", neg_emb, -in_emb)
    log_pos = jax.nn.log_sigmoid(pos_dot).sum(axis=1)
    log_neg = jax.nn.log_sigmoid(neg_dot).sum(axis=1)
    return -(log_pos + log_neg)


if __name__ == "__main__":
    # Small, deterministic config consistent with the module's forward:
    # C=3 -> P = 2*C = 6 positives, K=5 -> N = 2*C*K = 30 negatives.
    C, K = 3, 5
    VOCAB = 64
    EMBED = 32
    BATCH = 8
    P = 2 * C
    N = 2 * C * K

    key = jax.random.PRNGKey(0)
    k_in, k_out, k_lbl, k_pos, k_neg = jax.random.split(key, 5)

    in_embed_w = jax.random.normal(k_in, (VOCAB, EMBED), dtype=jnp.float32)
    out_embed_w = jax.random.normal(k_out, (VOCAB, EMBED), dtype=jnp.float32)

    input_labels = jax.random.randint(k_lbl, (BATCH,), 0, VOCAB, dtype=jnp.int32)
    pos_labels = jax.random.randint(k_pos, (BATCH, P), 0, VOCAB, dtype=jnp.int32)
    neg_labels = jax.random.randint(k_neg, (BATCH, N), 0, VOCAB, dtype=jnp.int32)

    # 1) exact-semantics path (float32 feed) vs the float32 reference
    loss_f32 = jax.jit(functools.partial(wordvec_loss, compute_dtype=jnp.float32))(
        in_embed_w, out_embed_w, input_labels, pos_labels, neg_labels)
    loss_f32 = jax.block_until_ready(loss_f32)
    ref_f32 = wordvec_loss_ref(in_embed_w, out_embed_w,
                               input_labels, pos_labels, neg_labels)
    assert loss_f32.shape == (BATCH,)
    assert jnp.allclose(loss_f32, ref_f32, atol=1e-4, rtol=1e-4), (loss_f32, ref_f32)

    # 2) default bandwidth-optimized path (bf16 feed) vs a bf16-quantized reference
    loss_bf16 = jax.jit(wordvec_loss)(in_embed_w, out_embed_w,
                                      input_labels, pos_labels, neg_labels)
    loss_bf16 = jax.block_until_ready(loss_bf16)
    ref_bf16 = wordvec_loss_ref(in_embed_w, out_embed_w,
                                input_labels, pos_labels, neg_labels,
                                cast_dtype=jnp.bfloat16)
    assert loss_bf16.shape == (BATCH,)
    assert jnp.allclose(loss_bf16, ref_bf16, atol=1e-3, rtol=1e-3), (loss_bf16, ref_bf16)

    print("KERNEL_OK")
</pallas_src>

<mosaic_0001>
module attributes {stable_mosaic.version = 11 : i64} {
  func.func @wordvec_kernel(%arg0: i32, %arg1: memref<32x128xf32, #tpu.memory_space<vmem>>, %arg2: memref<32x36x128xf32, #tpu.memory_space<vmem>>, %arg3: memref<1x128xf32, #tpu.memory_space<vmem>>) attributes {dimension_semantics = [#tpu.dimension_semantics<parallel>], iteration_bounds = array<i64: 1>, scalar_prefetch = 0 : i64, scratch_operands = 0 : i64, tpu.core_type = #tpu.core_type<tc>, window_params = [{transform_indices = @transform_0, window_bounds = array<i64: 32, 128>}, {transform_indices = @transform_1, window_bounds = array<i64: 32, 36, 128>}, {transform_indices = @transform_2, window_bounds = array<i64: 1, 128>}]} {
    %cst = arith.constant 0.000000e+00 : f32
    %0 = vector.broadcast %cst : f32 to vector<36x128xf32>
    %c0 = arith.constant 0 : index
    %c0_0 = arith.constant 0 : index
    %c0_1 = arith.constant 0 : index
    %1 = vector.load %arg2[%c0, %c0_0, %c0_1] : memref<32x36x128xf32, #tpu.memory_space<vmem>>, vector<8x36x128xf32>
    %c0_2 = arith.constant 0 : index
    %c0_3 = arith.constant 0 : index
    %2 = vector.load %arg1[%c0_2, %c0_3] : memref<32x128xf32, #tpu.memory_space<vmem>>, vector<8x128xf32>
    %3 = vector.shape_cast %2 : vector<8x128xf32> to vector<8x1x128xf32>
    %4 = vector.broadcast %3 : vector<8x1x128xf32> to vector<8x36x128xf32>
    %5 = arith.mulf %1, %4 : vector<8x36x128xf32>
    %cst_4 = arith.constant dense<0.000000e+00> : vector<36x128xf32>
    %6 = vector.multi_reduction <add>, %5, %cst_4 [0] : vector<8x36x128xf32> to vector<36x128xf32>
    %7 = arith.addf %0, %6 : vector<36x128xf32>
    %c8 = arith.constant 8 : index
    %c0_5 = arith.constant 0 : index
    %c0_6 = arith.constant 0 : index
    %8 = vector.load %arg2[%c8, %c0_5, %c0_6] : memref<32x36x128xf32, #tpu.memory_space<vmem>>, vector<8x36x128xf32>
    %c8_7 = arith.constant 8 : index
    %c0_8 = arith.constant 0 : index
    %9 = vector.load %arg1[%c8_7, %c0_8] : memref<32x128xf32, #tpu.memory_space<vmem>>, vector<8x128xf32>
    %10 = vector.shape_cast %9 : vector<8x128xf32> to vector<8x1x128xf32>
    %11 = vector.broadcast %10 : vector<8x1x128xf32> to vector<8x36x128xf32>
    %12 = arith.mulf %8, %11 : vector<8x36x128xf32>
    %cst_9 = arith.constant dense<0.000000e+00> : vector<36x128xf32>
    %13 = vector.multi_reduction <add>, %12, %cst_9 [0] : vector<8x36x128xf32> to vector<36x128xf32>
    %14 = arith.addf %7, %13 : vector<36x128xf32>
    %c16 = arith.constant 16 : index
    %c0_10 = arith.constant 0 : index
    %c0_11 = arith.constant 0 : index
    %15 = vector.load %arg2[%c16, %c0_10, %c0_11] : memref<32x36x128xf32, #tpu.memory_space<vmem>>, vector<8x36x128xf32>
    %c16_12 = arith.constant 16 : index
    %c0_13 = arith.constant 0 : index
    %16 = vector.load %arg1[%c16_12, %c0_13] : memref<32x128xf32, #tpu.memory_space<vmem>>, vector<8x128xf32>
    %17 = vector.shape_cast %16 : vector<8x128xf32> to vector<8x1x128xf32>
    %18 = vector.broadcast %17 : vector<8x1x128xf32> to vector<8x36x128xf32>
    %19 = arith.mulf %15, %18 : vector<8x36x128xf32>
    %cst_14 = arith.constant dense<0.000000e+00> : vector<36x128xf32>
    %20 = vector.multi_reduction <add>, %19, %cst_14 [0] : vector<8x36x128xf32> to vector<36x128xf32>
    %21 = arith.addf %14, %20 : vector<36x128xf32>
    %c24 = arith.constant 24 : index
    %c0_15 = arith.constant 0 : index
    %c0_16 = arith.constant 0 : index
    %22 = vector.load %arg2[%c24, %c0_15, %c0_16] : memref<32x36x128xf32, #tpu.memory_space<vmem>>, vector<8x36x128xf32>
    %c24_17 = arith.constant 24 : index
    %c0_18 = arith.constant 0 : index
    %23 = vector.load %arg1[%c24_17, %c0_18] : memref<32x128xf32, #tpu.memory_space<vmem>>, vector<8x128xf32>
    %24 = vector.shape_cast %23 : vector<8x128xf32> to vector<8x1x128xf32>
    %25 = vector.broadcast %24 : vector<8x1x128xf32> to vector<8x36x128xf32>
    %26 = arith.mulf %22, %25 : vector<8x36x128xf32>
    %cst_19 = arith.constant dense<0.000000e+00> : vector<36x128xf32>
    %27 = vector.multi_reduction <add>, %26, %cst_19 [0] : vector<8x36x128xf32> to vector<36x128xf32>
    %28 = arith.addf %21, %27 : vector<36x128xf32>
    %29 = tpu.iota {dimensions = array<i32: 0>} : vector<36x128xi32>
    %c6_i32 = arith.constant 6 : i32
    %30 = vector.broadcast %c6_i32 : i32 to vector<36x128xi32>
    %31 = arith.cmpi slt, %29, %30 : vector<36x128xi32>
    %cst_20 = arith.constant 0.000000e+00 : f32
    %32 = vector.broadcast %cst_20 : f32 to vector<36x128xf32>
    %33 = arith.subf %32, %28 : vector<36x128xf32>
    %34 = arith.select %31, %28, %33 : vector<36x128xi1>, vector<36x128xf32>
    %cst_21 = arith.constant 0.000000e+00 : f32
    %35 = vector.broadcast %cst_21 : f32 to vector<36x128xf32>
    %36 = arith.minimumf %34, %35 : vector<36x128xf32>
    %37 = math.absf %34 : vector<36x128xf32>
    %cst_22 = arith.constant 0.000000e+00 : f32
    %38 = vector.broadcast %cst_22 : f32 to vector<36x128xf32>
    %39 = arith.subf %38, %37 : vector<36x128xf32>
    %40 = math.exp %39 : vector<36x128xf32>
    %41 = math.log1p %40 : vector<36x128xf32>
    %42 = arith.subf %36, %41 : vector<36x128xf32>
    %cst_23 = arith.constant dense<0.000000e+00> : vector<128xf32>
    %43 = vector.multi_reduction <add>, %42, %cst_23 [0] : vector<36x128xf32> to vector<128xf32>
    %44 = vector.shape_cast %43 : vector<128xf32> to vector<1x128xf32>
    %cst_24 = arith.constant 0.000000e+00 : f32
    %45 = vector.broadcast %cst_24 : f32 to vector<1x128xf32>
    %46 = arith.subf %45, %44 : vector<1x128xf32>
    %c0_25 = arith.constant 0 : index
    %c0_26 = arith.constant 0 : index
    %47 = vector.load %arg3[%c0_25, %c0_26] : memref<1x128xf32, #tpu.memory_space<vmem>>, vector<1x128xf32>
    tpu.vector_store %arg3[%c0_25, %c0_26], %46 {strides = array<i32>} : memref<1x128xf32, #tpu.memory_space<vmem>>, vector<1x128xf32>,
    return
  }
  func.func @transform_0(%arg0: i32) -> (i32, i32) {
    %c0_i32 = arith.constant 0 : i32
    %c0_i32_0 = arith.constant 0 : i32
    return %c0_i32, %arg0 : i32, i32
  }
  func.func @transform_1(%arg0: i32) -> (i32, i32, i32) {
    %c0_i32 = arith.constant 0 : i32
    %c0_i32_0 = arith.constant 0 : i32
    %c0_i32_1 = arith.constant 0 : i32
    return %c0_i32, %c0_i32_0, %arg0 : i32, i32, i32
  }
  func.func @transform_2(%arg0: i32) -> (i32, i32) {
    %c0_i32 = arith.constant 0 : i32
    %c0_i32_0 = arith.constant 0 : i32
    return %c0_i32, %arg0 : i32, i32
  }
}

</mosaic_0001>

<bundles_post_ra>
// kernel: wordvec_loss.1
= control target key start
LH: loop header
LB: loop body
LE: loop exit
PB: predicated region body
PF: predicated region fallthrough
CT: control target
= control target key end

     0   :  { %vm144_vm0 = vcmask 1043456   ;;  %s1571_s0 = inlined_call_operand.vmem [shape: f32[32,128], index: 0, kind: input, shape index: {}]   ;;  %s1572_s1 = inlined_call_operand.vmem [shape: f32[32,36,128], index: 1, kind: input, shape index: {}]   ;;  %s1573_s2 = inlined_call_operand.vmem [shape: f32[1,128], index: 2, kind: output, shape index: {}]  }
   0x1   :  { %v51_v0 = vld [vmem:[%s1571_s0] sm:$0xff]  ;;  %v12_v2 = vld [vmem:[%s1572_s1 + $0x8] sm:$0xff]  ;;  %v13_v7 = vld [vmem:[%s1572_s1 + $0x10] sm:$0xff] }
   0x2   :  { %v11_v1 = vld [vmem:[%s1572_s1] sm:$0xff]  ;;  %v53_v3 = vrot.slane %v51_v0, 1  ;;  %v54_v4 = vrot.slane %v51_v0, 2  ;;  %v55_v5 = vrot.slane %v51_v0, 3  ;;  %v56_v6 = vrot.slane %v51_v0, 4  ;;  %v14_v8 = vld [vmem:[%s1572_s1 + $0x18] sm:$0xff] }
   0x3   :  { %v15_v9 = vld [vmem:[%s1572_s1 + $0x20] sm:$0xf]  ;;  %v16_v10 = vld [vmem:[%s1572_s1 + $0x28] sm:$0xff]  ;;  %v57_v11 = vrot.slane %v51_v0, 5  ;;  %v58_v12 = vrot.slane %v51_v0, 6  ;;  %v59_v13 = vrot.slane %v51_v0, 7 }
   0x4   :  { %v60_v14 = vperm.slane %v51_v0, 0  ;;  %v17_v15 = vld [vmem:[%s1572_s1 + $0x30] sm:$0xff]  ;;  %v18_v16 = vld [vmem:[%s1572_s1 + $0x38] sm:$0xff]  ;;  %v19_v17 = vld [vmem:[%s1572_s1 + $0x40] sm:$0xff]  ;;  %v61_v19 = vperm.slane %v53_v3, 0  ;;  %v62_v25 = vperm.slane %v54_v4, 0 }
   0x5   :  { %v20_v18 = vld [vmem:[%s1572_s1 + $0x48] sm:$0xf]  ;;  %v21_v20 = vld [vmem:[%s1572_s1 + $0x50] sm:$0xff]  ;;  %v22_v21 = vld [vmem:[%s1572_s1 + $0x58] sm:$0xff]  ;;  %v63_v26 = vperm.slane %v55_v5, 0  ;;  %v64_v27 = vperm.slane %v56_v6, 0 }
   0x6   :  { %v23_v22 = vld [vmem:[%s1572_s1 + $0x60] sm:$0xff]  ;;  %v24_v23 = vld [vmem:[%s1572_s1 + $0x68] sm:$0xff]  ;;  %v25_v24 = vld [vmem:[%s1572_s1 + $0x70] sm:$0xf]  ;;  %v65_v28 = vperm.slane %v57_v11, 0  ;;  %v952_v32 = vperm.slane %v58_v12, 0  ;;  %v76_v34 = vmul.f32 %v60_v14, %v11_v1  ;;  %v77_v35 = vmul.f32 %v60_v14, %v12_v2 }
   0x7   :  { %v26_v29 = vld [vmem:[%s1572_s1 + $0x78] sm:$0xff]  ;;  %v27_v30 = vld [vmem:[%s1572_s1 + $0x80] sm:$0xff]  ;;  %v28_v31 = vld [vmem:[%s1572_s1 + $0x88] sm:$0xff]  ;;  %v954_v33 = vperm.slane %v59_v13, 0  ;;  %v78_v39 = vmul.f32 %v60_v14, %v13_v7  ;;  %v79_v40 = vmul.f32 %v60_v14, %v14_v8  ;;  %v80_v41 = vmul.f32 %v60_v14, %v15_v9 }
   0x8   :  { %v29_v36 = vld [vmem:[%s1572_s1 + $0x90] sm:$0xff]  ;;  %v30_v37 = vld [vmem:[%s1572_s1 + $0x98] sm:$0xf]  ;;  %v31_v38 = vld [vmem:[%s1572_s1 + $0xa0] sm:$0xff]  ;;  %v81_v42 = vmul.f32 %v61_v19, %v16_v10  ;;  %v82_v46 = vmul.f32 %v61_v19, %v17_v15  ;;  %v83_v47 = vmul.f32 %v61_v19, %v18_v16  ;;  %v84_v48 = vmul.f32 %v61_v19, %v19_v17 }
   0x9   :  { %v32_v43 = vld [vmem:[%s1572_s1 + $0xa8] sm:$0xff]  ;;  %v33_v44 = vld [vmem:[%s1572_s1 + $0xb0] sm:$0xff]  ;;  %v34_v45 = vld [vmem:[%s1572_s1 + $0xb8] sm:$0xff]  ;;  %v85_v49 = vmul.f32 %v61_v19, %v20_v18  ;;  %v86_v53 = vmul.f32 %v62_v25, %v21_v20  ;;  %v87_v54 = vmul.f32 %v62_v25, %v22_v21  ;;  %v88_v55 = vmul.f32 %v62_v25, %v23_v22 }
   0xa   :  { %v35_v50 = vld [vmem:[%s1572_s1 + $0xc0] sm:$0xf]  ;;  %v36_v51 = vld [vmem:[%s1572_s1 + $0xc8] sm:$0xff]  ;;  %v37_v52 = vld [vmem:[%s1572_s1 + $0xd0] sm:$0xff]  ;;  %v89_v56 = vmul.f32 %v62_v25, %v24_v23  ;;  %v90_v60 = vmul.f32 %v62_v25, %v25_v24  ;;  %v91_v61 = vmul.f32 %v63_v26, %v26_v29  ;;  %v92_v62 = vmul.f32 %v63_v26, %v27_v30 }
   0xb   :  { %v38_v57 = vld [vmem:[%s1572_s1 + $0xd8] sm:$0xff]  ;;  %v39_v58 = vld [vmem:[%s1572_s1 + $0xe0] sm:$0xff]  ;;  %v40_v59 = vld [vmem:[%s1572_s1 + $0xe8] sm:$0xf]  ;;  %v93_v63 = vmul.f32 %v63_v26, %v28_v31  ;;  %v94_v3 = vmul.f32 %v63_v26, %v29_v36  ;;  %v95_v4 = vmul.f32 %v63_v26, %v30_v37  ;;  %v96_v5 = vmul.f32 %v64_v27, %v31_v38 }
   0xc   :  { %v41_v0 = vld [vmem:[%s1572_s1 + $0xf0] sm:$0xff]  ;;  %v42_v1 = vld [vmem:[%s1572_s1 + $0xf8] sm:$0xff]  ;;  %v43_v2 = vld [vmem:[%s1572_s1 + $0x100] sm:$0xff]  ;;  %v97_v6 = vmul.f32 %v64_v27, %v32_v43  ;;  %v98_v7 = vmul.f32 %v64_v27, %v33_v44  ;;  %v99_v8 = vmul.f32 %v64_v27, %v34_v45  ;;  %v100_v9 = vmul.f32 %v64_v27, %v35_v50 }
   0xd   :  { %v101_v10 = vmul.f32 %v65_v28, %v36_v51  ;;  %v44_v11 = vld [vmem:[%s1572_s1 + $0x108] sm:$0xff]  ;;  %v102_v12 = vmul.f32 %v65_v28, %v37_v52  ;;  %v103_v13 = vmul.f32 %v65_v28, %v38_v57  ;;  %v104_v14 = vmul.f32 %v65_v28, %v39_v58  ;;  %v45_v20 = vld [vmem:[%s1572_s1 + $0x110] sm:$0xf]  ;;  %v46_v21 = vld [vmem:[%s1572_s1 + $0x118] sm:$0xff] }
   0xe   :  { %v105_v15 = vmul.f32 %v65_v28, %v40_v59  ;;  %v106_v16 = vmul.f32 %v952_v32, %v41_v0  ;;  %v107_v17 = vmul.f32 %v952_v32, %v42_v1  ;;  %v108_v18 = vmul.f32 %v952_v32, %v43_v2  ;;  %v47_v30 = vld [vmem:[%s1572_s1 + $0x120] sm:$0xff]  ;;  %v48_v31 = vld [vmem:[%s1572_s1 + $0x128] sm:$0xff] }
   0xf   :  { %v116_v19 = vadd.f32 %v81_v42, %v76_v34  ;;  %v123_v22 = vadd.f32 %v82_v46, %v77_v35  ;;  %v130_v23 = vadd.f32 %v83_v47, %v78_v39  ;;  %v137_v24 = vadd.f32 %v84_v48, %v79_v40  ;;  %v50_v42 = vld [vmem:[%s1572_s1 + $0x138] sm:$0xf] }
  0x10   :  { %v145_v25 = vsel %vm144_vm0, %v80_v41, 0.0  ;;  %v109_v26 = vmul.f32 %v952_v32, %v44_v11  ;;  %v146_v28 = vsel %vm144_vm0, %v85_v49, 0.0  ;;  %v148_v29 = vsel %vm144_vm0, %v90_v60, 0.0  ;;  %v743_v11 = vld [vmem:[%s1572_s1 + $0x158] sm:$0xff] }
  0x11   :  { %v117_v27 = vadd.f32 %v116_v19, %v86_v53  ;;  %v124_v34 = vadd.f32 %v123_v22, %v87_v54  ;;  %v131_v35 = vadd.f32 %v130_v23, %v88_v55  ;;  %v138_v36 = vadd.f32 %v137_v24, %v89_v56  ;;  %v206_v54 = vld [vmem:[%s1571_s0 + $0x8] sm:$0xff]  ;;  %v744_v19 = vld [vmem:[%s1572_s1 + $0x160] sm:$0xf] }
  0x12   :  { %v147_v37 = vadd.f32 %v146_v28, %v145_v25  ;;  %v110_v38 = vmul.f32 %v952_v32, %v45_v20  ;;  %v111_v39 = vmul.f32 %v954_v33, %v46_v21  ;;  %v150_v41 = vsel %vm144_vm0, %v95_v4, 0.0  ;;  %v745_v20 = vld [vmem:[%s1572_s1 + $0x168] sm:$0xff]  ;;  %v746_v21 = vld [vmem:[%s1572_s1 + $0x170] sm:$0xff]  ;;  %v748_v23 = vld [vmem:[%s1572_s1 + $0x180] sm:$0xff] }
  0x13   :  { %v118_v40 = vadd.f32 %v117_v27, %v91_v61  ;;  %v125_v43 = vadd.f32 %v124_v34, %v92_v62  ;;  %v132_v44 = vadd.f32 %v131_v35, %v93_v63  ;;  %v139_v45 = vadd.f32 %v138_v36, %v94_v3  ;;  %v49_v63 = vld [vmem:[%s1572_s1 + $0x130] sm:$0xff]  ;;  %v749_v24 = vld [vmem:[%s1572_s1 + $0x188] sm:$0xf]  ;;  %v752_v35 = vld [vmem:[%s1572_s1 + $0x1a0] sm:$0xff] }
  0x14   :  { %v149_v46 = vadd.f32 %v148_v29, %v147_v37  ;;  %v112_v47 = vmul.f32 %v954_v33, %v47_v30  ;;  %v113_v48 = vmul.f32 %v954_v33, %v48_v31  ;;  %v152_v32 = vsel %vm144_vm0, %v100_v9, 0.0  ;;  %v741_v9 = vld [vmem:[%s1572_s1 + $0x148] sm:$0xff]  ;;  %v750_v25 = vld [vmem:[%s1572_s1 + $0x190] sm:$0xff] }
  0x15   :  { %v119_v49 = vadd.f32 %v118_v40, %v96_v5  ;;  %v126_v50 = vadd.f32 %v125_v43, %v97_v6  ;;  %v133_v51 = vadd.f32 %v132_v44, %v98_v7  ;;  %v140_v52 = vadd.f32 %v139_v45, %v99_v8  ;;  %v740_v7 = vld [vmem:[%s1572_s1 + $0x140] sm:$0xff]  ;;  %v753_v36 = vld [vmem:[%s1572_s1 + $0x1a8] sm:$0xff]  ;;  %v754_v37 = vld [vmem:[%s1572_s1 + $0x1b0] sm:$0xf] }
  0x16   :  { %v151_v53 = vadd.f32 %v150_v41, %v149_v46  ;;  %v115_v55 = vmul.f32 %v954_v33, %v50_v42  ;;  %v154_v57 = vsel %vm144_vm0, %v105_v15, 0.0  ;;  %v156_v58 = vsel %vm144_vm0, %v110_v38, 0.0  ;;  %v756_v40 = vld [vmem:[%s1572_s1 + $0x1c0] sm:$0xff]  ;;  %v757_v41 = vld [vmem:[%s1572_s1 + $0x1c8] sm:$0xff]  ;;  %v758_v46 = vld [vmem:[%s1572_s1 + $0x1d0] sm:$0xff] }
  0x17   :  { %v120_v56 = vadd.f32 %v119_v49, %v101_v10  ;;  %v127_v59 = vadd.f32 %v126_v50, %v102_v12  ;;  %v134_v60 = vadd.f32 %v133_v51, %v103_v13  ;;  %v141_v61 = vadd.f32 %v140_v52, %v104_v14  ;;  %v742_v10 = vld [vmem:[%s1572_s1 + $0x150] sm:$0xff]  ;;  %v761_v52 = vld [vmem:[%s1572_s1 + $0x1e8] sm:$0xff] }
  0x18   :  { %v153_v62 = vadd.f32 %v152_v32, %v151_v53  ;;  %v208_v1 = vrot.slane %v206_v54, 1  ;;  %v209_v2 = vrot.slane %v206_v54, 2  ;;  %v210_v3 = vrot.slane %v206_v54, 3  ;;  %v762_v53 = vld [vmem:[%s1572_s1 + $0x1f0] sm:$0xff] }
  0x19   :  { %v121_v0 = vadd.f32 %v120_v56, %v106_v16  ;;  %v128_v4 = vadd.f32 %v127_v59, %v107_v17  ;;  %v135_v5 = vadd.f32 %v134_v60, %v108_v18  ;;  %v211_v8 = vrot.slane %v206_v54, 4  ;;  %v764_v59 = vld [vmem:[%s1572_s1 + $0x200] sm:$0xf]  ;;  %v765_v60 = vld [vmem:[%s1572_s1 + $0x208] sm:$0xff] }
  0x1a   :  { %v155_v6 = vadd.f32 %v154_v57, %v153_v62  ;;  %v212_v12 = vrot.slane %v206_v54, 5  ;;  %v213_v13 = vrot.slane %v206_v54, 6  ;;  %v214_v14 = vrot.slane %v206_v54, 7 }
  0x1b   :  { %v215_v15 = vperm.slane %v206_v54, 0  ;;  %v1054_v16 = vmul.f32 %v954_v33, %v49_v63  ;;  %v1056_v17 = vadd.f32 %v141_v61, %v109_v26  ;;  %v1059_v18 = vsel %vm144_vm0, %v115_v55, 0.0  ;;  %v747_v33 = vld [vmem:[%s1572_s1 + $0x178] sm:$0xff]  ;;  %v766_v61 = vld [vmem:[%s1572_s1 + $0x210] sm:$0xff] }
  0x1c   :  { %v1073_v22 = vadd.f32 %v121_v0, %v111_v39  ;;  %v751_v26 = vld [vmem:[%s1572_s1 + $0x198] sm:$0xff]  ;;  %v216_v27 = vperm.slane %v208_v1, 0  ;;  %v217_v28 = vperm.slane %v209_v2, 0  ;;  %v218_v29 = vperm.slane %v210_v3, 0  ;;  %v768_v3 = vld [vmem:[%s1572_s1 + $0x220] sm:$0xff] }
  0x1d   :  { %v1087_v30 = vadd.f32 %v128_v4, %v112_v47  ;;  %v1089_v31 = vadd.f32 %v135_v5, %v113_v48  ;;  %v1091_v34 = vadd.f32 %v156_v58, %v155_v6  ;;  %v219_v38 = vperm.slane %v211_v8, 0  ;;  %v755_v39 = vld [vmem:[%s1572_s1 + $0x1b8] sm:$0xff]  ;;  %v760_v48 = vld [vmem:[%s1572_s1 + $0x1e0] sm:$0xff]  ;;  %v769_v4 = vld [vmem:[%s1572_s1 + $0x228] sm:$0xf] }
  0x1e   :  { %v220_v42 = vperm.slane %v212_v12, 0  ;;  %v1111_v43 = vperm.slane %v213_v13, 0  ;;  %v1113_v44 = vperm.slane %v214_v14, 0  ;;  %v231_v45 = vmul.f32 %v740_v7, %v215_v15  ;;  %v759_v47 = vld [vmem:[%s1572_s1 + $0x1d8] sm:$0xf] }
  0x1f   :  { %v232_v49 = vmul.f32 %v741_v9, %v215_v15  ;;  %v233_v32 = vmul.f32 %v742_v10, %v215_v15  ;;  %v234_v50 = vmul.f32 %v743_v11, %v215_v15  ;;  %v235_v51 = vmul.f32 %v744_v19, %v215_v15  ;;  %v763_v54 = vld [vmem:[%s1572_s1 + $0x1f8] sm:$0xff]  ;;  %v770_v9 = vld [vmem:[%s1572_s1 + $0x230] sm:$0xff]  ;;  %v772_v11 = vld [vmem:[%s1572_s1 + $0x240] sm:$0xff] }
  0x20   :  { %v236_v55 = vmul.f32 %v745_v20, %v216_v27  ;;  %v237_v56 = vmul.f32 %v746_v21, %v216_v27  ;;  %v238_v57 = vmul.f32 %v747_v33, %v216_v27  ;;  %v239_v58 = vmul.f32 %v748_v23, %v216_v27  ;;  %v767_v2 = vld [vmem:[%s1572_s1 + $0x218] sm:$0xff]  ;;  %v773_v19 = vld [vmem:[%s1572_s1 + $0x248] sm:$0xff] }
  0x21   :  { %v240_v62 = vmul.f32 %v749_v24, %v216_v27  ;;  %v241_v63 = vmul.f32 %v750_v25, %v217_v28  ;;  %v242_v0 = vmul.f32 %v751_v26, %v217_v28  ;;  %v243_v1 = vmul.f32 %v752_v35, %v217_v28  ;;  %v771_v10 = vld [vmem:[%s1572_s1 + $0x238] sm:$0xff] }
  0x22   :  { %v244_v5 = vmul.f32 %v753_v36, %v217_v28  ;;  %v245_v6 = vmul.f32 %v754_v37, %v217_v28  ;;  %v246_v7 = vmul.f32 %v755_v39, %v218_v29  ;;  %v247_v8 = vmul.f32 %v756_v40, %v218_v29  ;;  %v774_v37 = vld [vmem:[%s1572_s1 + $0x250] sm:$0xf]  ;;  %v775_v39 = vld [vmem:[%s1572_s1 + $0x258] sm:$0xff] }
  0x23   :  { %v248_v12 = vmul.f32 %v757_v41, %v218_v29  ;;  %v249_v13 = vmul.f32 %v758_v46, %v218_v29  ;;  %v250_v14 = vmul.f32 %v759_v47, %v218_v29  ;;  %v251_v15 = vmul.f32 %v760_v48, %v219_v38 }
  0x24   :  { %v252_v20 = vmul.f32 %v761_v52, %v219_v38  ;;  %v253_v21 = vmul.f32 %v762_v53, %v219_v38  ;;  %v254_v33 = vmul.f32 %v763_v54, %v219_v38  ;;  %v255_v23 = vmul.f32 %v764_v59, %v219_v38  ;;  %v776_v53 = vld [vmem:[%s1572_s1 + $0x260] sm:$0xff]  ;;  %v777_v54 = vld [vmem:[%s1572_s1 + $0x268] sm:$0xff] }
  0x25   :  { %v256_v24 = vmul.f32 %v765_v60, %v220_v42  ;;  %v257_v25 = vmul.f32 %v766_v61, %v220_v42  ;;  %v258_v26 = vmul.f32 %v767_v2, %v220_v42  ;;  %v259_v27 = vmul.f32 %v768_v3, %v220_v42 }
  0x26   :  { %v260_v28 = vmul.f32 %v769_v4, %v220_v42  ;;  %v261_v35 = vmul.f32 %v770_v9, %v1111_v43  ;;  %v262_v36 = vmul.f32 %v771_v10, %v1111_v43  ;;  %v263_v29 = vmul.f32 %v772_v11, %v1111_v43  ;;  %v360_v9 = vld [vmem:[%s1571_s0 + $0x10] sm:$0xff] }
  0x27   :  { %v264_v38 = vmul.f32 %v773_v19, %v1111_v43  ;;  %v271_v40 = vadd.f32 %v236_v55, %v231_v45  ;;  %v278_v41 = vadd.f32 %v237_v56, %v232_v49  ;;  %v285_v46 = vadd.f32 %v238_v57, %v233_v32  ;;  %v778_v56 = vld [vmem:[%s1572_s1 + $0x270] sm:$0xff]  ;;  %v779_v57 = vld [vmem:[%s1572_s1 + $0x278] sm:$0xf] }
  0x28   :  { %v292_v42 = vadd.f32 %v239_v58, %v234_v50  ;;  %v299_v47 = vsel %vm144_vm0, %v235_v51, 0.0  ;;  %v300_v48 = vsel %vm144_vm0, %v240_v62, 0.0  ;;  %v302_v52 = vsel %vm144_vm0, %v245_v6, 0.0 }
  0x29   :  { %v272_v59 = vadd.f32 %v271_v40, %v241_v63  ;;  %v279_v60 = vadd.f32 %v278_v41, %v242_v0  ;;  %v286_v45 = vadd.f32 %v285_v46, %v243_v1  ;;  %v301_v49 = vadd.f32 %v300_v48, %v299_v47 }
  0x2a   :  { %v265_v32 = vmul.f32 %v774_v37, %v1111_v43  ;;  %v266_v50 = vmul.f32 %v775_v39, %v1113_v44  ;;  %v293_v51 = vadd.f32 %v292_v42, %v244_v5  ;;  %v304_v55 = vsel %vm144_vm0, %v250_v14, 0.0 }
  0x2b   :  { %v273_v58 = vadd.f32 %v272_v59, %v246_v7  ;;  %v280_v61 = vadd.f32 %v279_v60, %v247_v8  ;;  %v287_v62 = vadd.f32 %v286_v45, %v248_v12  ;;  %v303_v63 = vadd.f32 %v302_v52, %v301_v49  ;;  %v786_v45 = vld [vmem:[%s1572_s1 + $0x2b0] sm:$0xff]  ;;  %v787_v49 = vld [vmem:[%s1572_s1 + $0x2b8] sm:$0xff] }
  0x2c   :  { %v267_v0 = vmul.f32 %v776_v53, %v1113_v44  ;;  %v268_v43 = vmul.f32 %v777_v54, %v1113_v44  ;;  %v294_v1 = vadd.f32 %v293_v51, %v249_v13  ;;  %v306_v2 = vsel %vm144_vm0, %v255_v23, 0.0  ;;  %v791_v51 = vld [vmem:[%s1572_s1 + $0x2d8] sm:$0xff] }
  0x2d   :  { %v274_v3 = vadd.f32 %v273_v58, %v251_v15  ;;  %v281_v4 = vadd.f32 %v280_v61, %v252_v20  ;;  %v288_v5 = vadd.f32 %v287_v62, %v253_v21  ;;  %v305_v6 = vadd.f32 %v304_v55, %v303_v63  ;;  %v792_v55 = vld [vmem:[%s1572_s1 + $0x2e0] sm:$0xff] }
  0x2e   :  { %v269_v7 = vmul.f32 %v778_v56, %v1113_v44  ;;  %v270_v8 = vmul.f32 %v779_v57, %v1113_v44  ;;  %v295_v10 = vadd.f32 %v294_v1, %v254_v33  ;;  %v308_v11 = vsel %vm144_vm0, %v260_v28, 0.0  ;;  %v794_v1 = vld [vmem:[%s1572_s1 + $0x2f0] sm:$0xf] }
  0x2f   :  { %v275_v12 = vadd.f32 %v274_v3, %v256_v24  ;;  %v282_v14 = vadd.f32 %v281_v4, %v257_v25  ;;  %v289_v13 = vadd.f32 %v288_v5, %v258_v26  ;;  %v307_v19 = vadd.f32 %v306_v2, %v305_v6  ;;  %v780_v25 = vld [vmem:[%s1572_s1 + $0x280] sm:$0xff]  ;;  %v781_v26 = vld [vmem:[%s1572_s1 + $0x288] sm:$0xff]  ;;  %v795_v2 = vld [vmem:[%s1572_s1 + $0x2f8] sm:$0xff] }
  0x30   :  { %v296_v23 = vadd.f32 %v295_v10, %v259_v27  ;;  %v310_v15 = vsel %vm144_vm0, %v265_v32, 0.0  ;;  %v362_v20 = vrot.slane %v360_v9, 1  ;;  %v363_v21 = vrot.slane %v360_v9, 2  ;;  %v788_v32 = vld [vmem:[%s1572_s1 + $0x2c0] sm:$0xff] }
  0x31   :  { %v276_v37 = vadd.f32 %v275_v12, %v261_v35  ;;  %v283_v39 = vadd.f32 %v282_v14, %v262_v36  ;;  %v290_v40 = vadd.f32 %v289_v13, %v263_v29  ;;  %v309_v41 = vadd.f32 %v308_v11, %v307_v19  ;;  %v782_v35 = vld [vmem:[%s1572_s1 + $0x290] sm:$0xff]  ;;  %v783_v36 = vld [vmem:[%s1572_s1 + $0x298] sm:$0xff]  ;;  %v784_v29 = vld [vmem:[%s1572_s1 + $0x2a0] sm:$0xf] }
  0x32   :  { %v297_v46 = vadd.f32 %v296_v23, %v264_v38  ;;  %v364_v42 = vrot.slane %v360_v9, 3  ;;  %v365_v47 = vrot.slane %v360_v9, 4  ;;  %v366_v44 = vrot.slane %v360_v9, 5  ;;  %v785_v38 = vld [vmem:[%s1572_s1 + $0x2a8] sm:$0xff]  ;;  %v802_v13 = vld [vmem:[%s1572_s1 + $0x330] sm:$0xff]  ;;  %v803_v19 = vld [vmem:[%s1572_s1 + $0x338] sm:$0xff] }
  0x33   :  { %v277_v33 = vadd.f32 %v276_v37, %v266_v50  ;;  %v284_v48 = vadd.f32 %v283_v39, %v267_v0  ;;  %v291_v28 = vadd.f32 %v290_v40, %v268_v43  ;;  %v311_v24 = vadd.f32 %v310_v15, %v309_v41  ;;  %v793_v43 = vld [vmem:[%s1572_s1 + $0x2e8] sm:$0xff]  ;;  %v804_v23 = vld [vmem:[%s1572_s1 + $0x340] sm:$0xf]  ;;  %v806_v40 = vld [vmem:[%s1572_s1 + $0x350] sm:$0xff] }
  0x34   :  { %v312_v27 = vsel %vm144_vm0, %v270_v8, 0.0  ;;  %v367_v52 = vrot.slane %v360_v9, 6  ;;  %v368_v53 = vrot.slane %v360_v9, 7  ;;  %v369_v54 = vperm.slane %v360_v9, 0  ;;  %v799_v9 = vld [vmem:[%s1572_s1 + $0x318] sm:$0xf] }
  0x35   :  { %v1222_v59 = vadd.f32 %v1056_v17, %v1054_v16  ;;  %v1226_v60 = vadd.f32 %v1059_v18, %v1091_v34  ;;  %v789_v16 = vld [vmem:[%s1572_s1 + $0x2c8] sm:$0xf]  ;;  %v370_v17 = vperm.slane %v362_v20, 0  ;;  %v371_v50 = vperm.slane %v363_v21, 0  ;;  %v790_v34 = vld [vmem:[%s1572_s1 + $0x2d0] sm:$0xff]  ;;  %v807_v41 = vld [vmem:[%s1572_s1 + $0x358] sm:$0xff] }
  0x36   :  { %v1240_v18 = vadd.f32 %v297_v46, %v269_v7  ;;  %v372_v56 = vperm.slane %v364_v42, 0  ;;  %v373_v57 = vperm.slane %v365_v47, 0  ;;  %v374_v58 = vperm.slane %v366_v44, 0  ;;  %v800_v7 = vld [vmem:[%s1572_s1 + $0x320] sm:$0xff]  ;;  %v801_v8 = vld [vmem:[%s1572_s1 + $0x328] sm:$0xff] }
  0x37   :  { %v1251_v61 = vadd.f32 %v312_v27, %v311_v24  ;;  %v1254_v62 = vadd.f32 %v277_v33, %v1073_v22  ;;  %v1257_v63 = vadd.f32 %v284_v48, %v1087_v30  ;;  %v1260_v0 = vadd.f32 %v291_v28, %v1089_v31  ;;  %v796_v22 = vld [vmem:[%s1572_s1 + $0x300] sm:$0xff]  ;;  %v797_v30 = vld [vmem:[%s1572_s1 + $0x308] sm:$0xff]  ;;  %v798_v31 = vld [vmem:[%s1572_s1 + $0x310] sm:$0xff] }
  0x38   :  { %v375_v3 = vperm.slane %v367_v52, 0  ;;  %v1280_v4 = vperm.slane %v368_v53, 0  ;;  %v385_v5 = vmul.f32 %v780_v25, %v369_v54  ;;  %v386_v6 = vmul.f32 %v781_v26, %v369_v54  ;;  %v805_v39 = vld [vmem:[%s1572_s1 + $0x348] sm:$0xff]  ;;  %v808_v33 = vld [vmem:[%s1572_s1 + $0x360] sm:$0xff]  ;;  %v810_v28 = vld [vmem:[%s1572_s1 + $0x370] sm:$0xff] }
  0x39   :  { %v387_v10 = vmul.f32 %v782_v35, %v369_v54  ;;  %v388_v11 = vmul.f32 %v783_v36, %v369_v54  ;;  %v389_v12 = vmul.f32 %v784_v29, %v369_v54  ;;  %v390_v14 = vmul.f32 %v785_v38, %v370_v17  ;;  %v809_v48 = vld [vmem:[%s1572_s1 + $0x368] sm:$0xf]  ;;  %v811_v35 = vld [vmem:[%s1572_s1 + $0x378] sm:$0xff]  ;;  %v812_v36 = vld [vmem:[%s1572_s1 + $0x380] sm:$0xff] }
  0x3a   :  { %v391_v15 = vmul.f32 %v786_v45, %v370_v17  ;;  %v392_v20 = vmul.f32 %v787_v49, %v370_v17  ;;  %v393_v21 = vmul.f32 %v788_v32, %v370_v17  ;;  %v394_v37 = vmul.f32 %v789_v16, %v370_v17  ;;  %v813_v29 = vld [vmem:[%s1572_s1 + $0x388] sm:$0xff]  ;;  %v814_v17 = vld [vmem:[%s1572_s1 + $0x390] sm:$0xf] }
  0x3b   :  { %v395_v46 = vmul.f32 %v790_v34, %v371_v50  ;;  %v396_v42 = vmul.f32 %v791_v51, %v371_v50  ;;  %v397_v47 = vmul.f32 %v792_v55, %v371_v50  ;;  %v398_v44 = vmul.f32 %v793_v43, %v371_v50 }
  0x3c   :  { %v399_v24 = vmul.f32 %v794_v1, %v371_v50  ;;  %v400_v25 = vmul.f32 %v795_v2, %v372_v56  ;;  %v401_v26 = vmul.f32 %v796_v22, %v372_v56  ;;  %v402_v27 = vmul.f32 %v797_v30, %v372_v56 }
  0x3d   :  { %v403_v38 = vmul.f32 %v798_v31, %v372_v56  ;;  %v404_v52 = vmul.f32 %v799_v9, %v372_v56  ;;  %v405_v53 = vmul.f32 %v800_v7, %v373_v57  ;;  %v406_v54 = vmul.f32 %v801_v8, %v373_v57  ;;  %v815_v56 = vld [vmem:[%s1572_s1 + $0x398] sm:$0xff] }
  0x3e   :  { %v407_v45 = vmul.f32 %v802_v13, %v373_v57  ;;  %v408_v49 = vmul.f32 %v803_v19, %v373_v57  ;;  %v409_v32 = vmul.f32 %v804_v23, %v373_v57  ;;  %v410_v16 = vmul.f32 %v805_v39, %v374_v58  ;;  %v816_v57 = vld [vmem:[%s1572_s1 + $0x3a0] sm:$0xff]  ;;  %v817_v23 = vld [vmem:[%s1572_s1 + $0x3a8] sm:$0xff]  ;;  %v818_v39 = vld [vmem:[%s1572_s1 + $0x3b0] sm:$0xff] }
  0x3f   :  { %v411_v50 = vmul.f32 %v806_v40, %v374_v58  ;;  %v412_v34 = vmul.f32 %v807_v41, %v374_v58  ;;  %v413_v51 = vmul.f32 %v808_v33, %v374_v58  ;;  %v414_v55 = vmul.f32 %v809_v48, %v374_v58 }
  0x40   :  { %v415_v43 = vmul.f32 %v810_v28, %v375_v3  ;;  %v416_v1 = vmul.f32 %v811_v35, %v375_v3  ;;  %v417_v2 = vmul.f32 %v812_v36, %v375_v3  ;;  %v418_v22 = vmul.f32 %v813_v29, %v375_v3  ;;  %v514_v35 = vld [vmem:[%s1571_s0 + $0x18] sm:$0xff] }
  0x41   :  { %v425_v30 = vadd.f32 %v390_v14, %v385_v5  ;;  %v432_v31 = vadd.f32 %v391_v15, %v386_v6  ;;  %v439_v9 = vadd.f32 %v392_v20, %v387_v10  ;;  %v446_v7 = vadd.f32 %v393_v21, %v388_v11  ;;  %v819_v15 = vld [vmem:[%s1572_s1 + $0x3b8] sm:$0xf] }
  0x42   :  { %v419_v8 = vmul.f32 %v814_v17, %v375_v3  ;;  %v453_v13 = vsel %vm144_vm0, %v389_v12, 0.0  ;;  %v454_v58 = vsel %vm144_vm0, %v394_v37, 0.0  ;;  %v456_v19 = vsel %vm144_vm0, %v399_v24, 0.0 }
  0x43   :  { %v426_v40 = vadd.f32 %v425_v30, %v395_v46  ;;  %v433_v5 = vadd.f32 %v432_v31, %v396_v42  ;;  %v440_v6 = vadd.f32 %v439_v9, %v397_v47  ;;  %v447_v10 = vadd.f32 %v446_v7, %v398_v44 }
  0x44   :  { %v420_v3 = vmul.f32 %v815_v56, %v1280_v4  ;;  %v421_v11 = vmul.f32 %v816_v57, %v1280_v4  ;;  %v455_v12 = vadd.f32 %v454_v58, %v453_v13  ;;  %v458_v14 = vsel %vm144_vm0, %v404_v52, 0.0 }
  0x45   :  { %v427_v20 = vadd.f32 %v426_v40, %v400_v25  ;;  %v434_v21 = vadd.f32 %v433_v5, %v401_v26  ;;  %v441_v37 = vadd.f32 %v440_v6, %v402_v27  ;;  %v448_v41 = vadd.f32 %v447_v10, %v403_v38  ;;  %v830_v40 = vld [vmem:[%s1572_s1 + $0x410] sm:$0xff]  ;;  %v828_v10 = vld [vmem:[%s1572_s1 + $0x400] sm:$0xff] }
  0x46   :  { %v422_v46 = vmul.f32 %v817_v23, %v1280_v4  ;;  %v423_v42 = vmul.f32 %v818_v39, %v1280_v4  ;;  %v457_v47 = vadd.f32 %v456_v19, %v455_v12  ;;  %v460_v44 = vsel %vm144_vm0, %v409_v32, 0.0  ;;  %v823_v19 = vld [vmem:[%s1572_s1 + $0x3d8] sm:$0xff]  ;;  %v824_v23 = vld [vmem:[%s1572_s1 + $0x3e0] sm:$0xf] }
  0x47   :  { %v428_v33 = vadd.f32 %v427_v20, %v405_v53  ;;  %v435_v48 = vadd.f32 %v434_v21, %v406_v54  ;;  %v442_v28 = vadd.f32 %v441_v37, %v407_v45  ;;  %v449_v24 = vadd.f32 %v448_v41, %v408_v49  ;;  %v827_v39 = vld [vmem:[%s1572_s1 + $0x3f8] sm:$0xff] }
  0x48   :  { %v424_v25 = vmul.f32 %v819_v15, %v1280_v4  ;;  %v459_v26 = vadd.f32 %v458_v14, %v457_v47  ;;  %v462_v27 = vsel %vm144_vm0, %v414_v55, 0.0  ;;  %v464_v36 = vsel %vm144_vm0, %v419_v8, 0.0  ;;  %v835_v47 = vld [vmem:[%s1572_s1 + $0x438] sm:$0xff] }
  0x49   :  { %v429_v29 = vadd.f32 %v428_v33, %v410_v16  ;;  %v436_v38 = vadd.f32 %v435_v48, %v411_v50  ;;  %v443_v52 = vadd.f32 %v442_v28, %v412_v34  ;;  %v450_v17 = vadd.f32 %v449_v24, %v413_v51  ;;  %v820_v51 = vld [vmem:[%s1572_s1 + $0x3c0] sm:$0xff] }
  0x4a   :  { %v461_v32 = vadd.f32 %v460_v44, %v459_v26  ;;  %v516_v53 = vrot.slane %v514_v35, 1  ;;  %v517_v54 = vrot.slane %v514_v35, 2  ;;  %v518_v45 = vrot.slane %v514_v35, 3  ;;  %v840_v44 = vld [vmem:[%s1572_s1 + $0x460] sm:$0xff]  ;;  %v845_v26 = vld [vmem:[%s1572_s1 + $0x488] sm:$0xff] }
  0x4b   :  { %v430_v49 = vadd.f32 %v429_v29, %v415_v43  ;;  %v437_v56 = vadd.f32 %v436_v38, %v416_v1  ;;  %v444_v57 = vadd.f32 %v443_v52, %v417_v2  ;;  %v519_v30 = vrot.slane %v514_v35, 4  ;;  %v821_v1 = vld [vmem:[%s1572_s1 + $0x3c8] sm:$0xff]  ;;  %v822_v2 = vld [vmem:[%s1572_s1 + $0x3d0] sm:$0xff]  ;;  %v839_v52 = vld [vmem:[%s1572_s1 + $0x458] sm:$0xf] }
  0x4c   :  { %v451_v31 = vadd.f32 %v450_v17, %v418_v22  ;;  %v463_v9 = vadd.f32 %v462_v27, %v461_v32  ;;  %v520_v4 = vrot.slane %v514_v35, 5  ;;  %v521_v7 = vrot.slane %v514_v35, 6  ;;  %v842_v17 = vld [vmem:[%s1572_s1 + $0x470] sm:$0xff] }
  0x4d   :  { %v1362_v55 = vadd.f32 %v1240_v18, %v1222_v59  ;;  %v431_v16 = vadd.f32 %v430_v49, %v420_v3  ;;  %v438_v50 = vadd.f32 %v437_v56, %v421_v11  ;;  %v445_v34 = vadd.f32 %v444_v57, %v422_v46  ;;  %v825_v59 = vld [vmem:[%s1572_s1 + $0x3e8] sm:$0xff]  ;;  %v826_v18 = vld [vmem:[%s1572_s1 + $0x3f0] sm:$0xff]  ;;  %v831_v11 = vld [vmem:[%s1572_s1 + $0x418] sm:$0xff] }
  0x4e   :  { %v465_v8 = vadd.f32 %v464_v36, %v463_v9  ;;  %v466_v43 = vsel %vm144_vm0, %v424_v25, 0.0  ;;  %v522_v22 = vrot.slane %v514_v35, 7  ;;  %v523_v13 = vperm.slane %v514_v35, 0  ;;  %v829_v3 = vld [vmem:[%s1572_s1 + $0x408] sm:$0xf]  ;;  %v832_v46 = vld [vmem:[%s1572_s1 + $0x420] sm:$0xff] }
  0x4f   :  { %v1382_v58 = vadd.f32 %v1251_v61, %v1226_v60  ;;  %v524_v5 = vperm.slane %v516_v53, 0  ;;  %v525_v6 = vperm.slane %v517_v54, 0  ;;  %v526_v60 = vperm.slane %v518_v45, 0  ;;  %v838_v35 = vld [vmem:[%s1572_s1 + $0x450] sm:$0xff]  ;;  %v841_v25 = vld [vmem:[%s1572_s1 + $0x468] sm:$0xff]  ;;  %v843_v56 = vld [vmem:[%s1572_s1 + $0x478] sm:$0xff] }
  0x50   :  { %v1396_v61 = vadd.f32 %v451_v31, %v423_v42  ;;  %v527_v12 = vperm.slane %v519_v30, 0  ;;  %v528_v14 = vperm.slane %v520_v4, 0  ;;  %v1407_v15 = vperm.slane %v521_v7, 0  ;;  %v833_v42 = vld [vmem:[%s1572_s1 + $0x428] sm:$0xff]  ;;  %v846_v32 = vld [vmem:[%s1572_s1 + $0x490] sm:$0xff] }
  0x51   :  { %v1409_v20 = vadd.f32 %v466_v43, %v465_v8  ;;  %v1412_v21 = vadd.f32 %v431_v16, %v1254_v62  ;;  %v1415_v37 = vadd.f32 %v438_v50, %v1257_v63  ;;  %v1418_v41 = vadd.f32 %v445_v34, %v1260_v0  ;;  %v836_v62 = vld [vmem:[%s1572_s1 + $0x440] sm:$0xff]  ;;  %v834_v63 = vld [vmem:[%s1572_s1 + $0x430] sm:$0xf]  ;;  %v837_v0 = vld [vmem:[%s1572_s1 + $0x448] sm:$0xff] }
  0x52   :  { %v1441_v33 = vperm.slane %v522_v22, 0  ;;  %v539_v48 = vmul.f32 %v820_v51, %v523_v13  ;;  %v540_v28 = vmul.f32 %v821_v1, %v523_v13  ;;  %v541_v24 = vmul.f32 %v822_v2, %v523_v13  ;;  %v844_v57 = vld [vmem:[%s1572_s1 + $0x480] sm:$0xf]  ;;  %v850_v30 = vld [vmem:[%s1572_s1 + $0x4b0] sm:$0xff]  ;;  %v847_v16 = vld [vmem:[%s1572_s1 + $0x498] sm:$0xff] }
  0x53   :  { %v542_v27 = vmul.f32 %v823_v19, %v523_v13  ;;  %v543_v36 = vmul.f32 %v824_v23, %v523_v13  ;;  %v544_v29 = vmul.f32 %v825_v59, %v524_v5  ;;  %v545_v38 = vmul.f32 %v826_v18, %v524_v5  ;;  %v848_v50 = vld [vmem:[%s1572_s1 + $0x4a0] sm:$0xff]  ;;  %v849_v34 = vld [vmem:[%s1572_s1 + $0x4a8] sm:$0xf]  ;;  %v851_v2 = vld [vmem:[%s1572_s1 + $0x4b8] sm:$0xff] }
  0x54   :  { %v546_v53 = vmul.f32 %v827_v39, %v524_v5  ;;  %v547_v54 = vmul.f32 %v828_v10, %v524_v5  ;;  %v548_v45 = vmul.f32 %v829_v3, %v524_v5  ;;  %v549_v49 = vmul.f32 %v830_v40, %v525_v6  ;;  %v852_v59 = vld [vmem:[%s1572_s1 + $0x4c0] sm:$0xff]  ;;  %v853_v18 = vld [vmem:[%s1572_s1 + $0x4c8] sm:$0xff]  ;;  %v854_v10 = vld [vmem:[%s1572_s1 + $0x4d0] sm:$0xf] }
  0x55   :  { %v550_v31 = vmul.f32 %v831_v11, %v525_v6  ;;  %v551_v9 = vmul.f32 %v832_v46, %v525_v6  ;;  %v552_v4 = vmul.f32 %v833_v42, %v525_v6  ;;  %v553_v7 = vmul.f32 %v834_v63, %v525_v6 }
  0x56   :  { %v554_v51 = vmul.f32 %v835_v47, %v526_v60  ;;  %v555_v8 = vmul.f32 %v836_v62, %v526_v60  ;;  %v556_v43 = vmul.f32 %v837_v0, %v526_v60  ;;  %v557_v1 = vmul.f32 %v838_v35, %v526_v60  ;;  %v856_v0 = vld [vmem:[%s1572_s1 + $0x4e0] sm:$0xff] }
  0x57   :  { %v558_v22 = vmul.f32 %v839_v52, %v526_v60  ;;  %v559_v13 = vmul.f32 %v840_v44, %v527_v12  ;;  %v560_v19 = vmul.f32 %v841_v25, %v527_v12  ;;  %v561_v23 = vmul.f32 %v842_v17, %v527_v12 }
  0x58   :  { %v562_v39 = vmul.f32 %v843_v56, %v527_v12  ;;  %v563_v40 = vmul.f32 %v844_v57, %v527_v12  ;;  %v564_v5 = vmul.f32 %v845_v26, %v528_v14  ;;  %v565_v6 = vmul.f32 %v846_v32, %v528_v14  ;;  %v855_v12 = vld [vmem:[%s1572_s1 + $0x4d8] sm:$0xff] }
  0x59   :  { %v566_v3 = vmul.f32 %v847_v16, %v528_v14  ;;  %v567_v11 = vmul.f32 %v848_v50, %v528_v14  ;;  %v568_v46 = vmul.f32 %v849_v34, %v528_v14  ;;  %v569_v42 = vmul.f32 %v850_v30, %v1407_v15 }
  0x5a   :  { %v570_v47 = vmul.f32 %v851_v2, %v1407_v15  ;;  %v571_v60 = vmul.f32 %v852_v59, %v1407_v15  ;;  %v572_v62 = vmul.f32 %v853_v18, %v1407_v15  ;;  %v579_v63 = vadd.f32 %v544_v29, %v539_v48  ;;  %v857_v29 = vld [vmem:[%s1572_s1 + $0x4e8] sm:$0xff] }
  0x5b   :  { %v586_v44 = vadd.f32 %v545_v38, %v540_v28  ;;  %v593_v35 = vadd.f32 %v546_v53, %v541_v24  ;;  %v600_v14 = vadd.f32 %v547_v54, %v542_v27  ;;  %v607_v25 = vsel %vm144_vm0, %v543_v36, 0.0  ;;  %v858_v36 = vld [vmem:[%s1572_s1 + $0x4f0] sm:$0xff]  ;;  %v859_v38 = vld [vmem:[%s1572_s1 + $0x4f8] sm:$0xf] }
  0x5c   :  { %v573_v26 = vmul.f32 %v854_v10, %v1407_v15  ;;  %v580_v52 = vadd.f32 %v579_v63, %v549_v49  ;;  %v608_v17 = vsel %vm144_vm0, %v548_v45, 0.0  ;;  %v610_v48 = vsel %vm144_vm0, %v553_v7, 0.0 }
  0x5d   :  { %v587_v32 = vadd.f32 %v586_v44, %v550_v31  ;;  %v594_v56 = vadd.f32 %v593_v35, %v551_v9  ;;  %v601_v57 = vadd.f32 %v600_v14, %v552_v4  ;;  %v609_v30 = vadd.f32 %v608_v17, %v607_v25 }
  0x5e   :  { %v574_v28 = vmul.f32 %v855_v12, %v1441_v33  ;;  %v575_v24 = vmul.f32 %v856_v0, %v1441_v33  ;;  %v581_v27 = vadd.f32 %v580_v52, %v554_v51  ;;  %v612_v15 = vsel %vm144_vm0, %v558_v22, 0.0 }
  0x5f   :  { %v588_v53 = vadd.f32 %v587_v32, %v555_v8  ;;  %v595_v54 = vadd.f32 %v594_v56, %v556_v43  ;;  %v602_v45 = vadd.f32 %v601_v57, %v557_v1  ;;  %v611_v49 = vadd.f32 %v610_v48, %v609_v30 }
  0x60   :  { %v576_v31 = vmul.f32 %v857_v29, %v1441_v33  ;;  %v582_v9 = vadd.f32 %v581_v27, %v559_v13  ;;  %v614_v4 = vsel %vm144_vm0, %v563_v40, 0.0  ;;  %v627_v7 = vlaneseq }
  0x61   :  { %v589_v16 = vadd.f32 %v588_v53, %v560_v19  ;;  %v596_v50 = vadd.f32 %v595_v54, %v561_v23  ;;  %v603_v34 = vadd.f32 %v602_v45, %v562_v39  ;;  %v613_v51 = vadd.f32 %v612_v15, %v611_v49 }
  0x62   :  { %v577_v2 = vmul.f32 %v858_v36, %v1441_v33  ;;  %v578_v59 = vmul.f32 %v859_v38, %v1441_v33  ;;  %v583_v18 = vadd.f32 %v582_v9, %v564_v5  ;;  %v616_v8 = vsel %vm144_vm0, %v568_v46, 0.0 }
  0x63   :  { %v590_v43 = vadd.f32 %v589_v16, %v565_v6  ;;  %v597_v1 = vadd.f32 %v596_v50, %v566_v3  ;;  %v604_v22 = vadd.f32 %v603_v34, %v567_v11  ;;  %v615_v10 = vadd.f32 %v614_v4, %v613_v51 }
  0x64   :  { %v471_v13 = vadd.f32 %v1396_v61, %v1362_v55  ;;  %v584_v40 = vadd.f32 %v583_v18, %v569_v42  ;;  %v618_v19 = vsel %vm144_vm0, %v573_v26, 0.0  ;;  %v628_v23 = vshrl.u32 %v627_v7, 7 }
  0x65   :  { %v591_v39 = vadd.f32 %v590_v43, %v570_v47  ;;  %v598_v63 = vadd.f32 %v597_v1, %v571_v60  ;;  %v605_v12 = vadd.f32 %v604_v22, %v572_v62  ;;  %v617_v0 = vadd.f32 %v616_v8, %v615_v10 }
  0x66   :  { %v472_v33 = vadd.f32 %v1409_v20, %v1382_v58  ;;  %v585_v5 = vadd.f32 %v584_v40, %v574_v28  ;;  %v620_v6 = vsel %vm144_vm0, %v578_v59, 0.0  ;;  %vm633_vm1 = vcmp.lt.s32.totalorder %v628_v23, 6 }
  0x67   :  { %v592_v3 = vadd.f32 %v591_v39, %v575_v24  ;;  %v599_v11 = vadd.f32 %v598_v63, %v576_v31  ;;  %v606_v46 = vadd.f32 %v605_v12, %v577_v2  ;;  %v619_v44 = vadd.f32 %v618_v19, %v617_v0 }
  0x68   :  { %v622_v55 = vadd.f32 %v585_v5, %v1412_v21 }
  0x69   :  { %v621_v61 = vadd.f32 %v620_v6, %v619_v44  ;;  %v623_v42 = vadd.f32 %v592_v3, %v1415_v37  ;;  %v624_v47 = vadd.f32 %v599_v11, %v1418_v41  ;;  %v1531_v60 = vadd.f32 %v606_v46, %v471_v13 }
  0x6a   :  { %v638_v62 = vsub.f32 0.0, %v622_v55 }
  0x6b   :  { %v1533_v35 = vadd.f32 %v621_v61, %v472_v33  ;;  %v639_v58 = vsub.f32 0.0, %v623_v42  ;;  %v640_v20 = vsub.f32 0.0, %v624_v47  ;;  %v641_v14 = vsub.f32 0.0, %v1531_v60 }
  0x6c   :  { %v1536_v25 = vsel %vm633_vm1, %v622_v55, %v638_v62 }
  0x6d   :  { %v642_v26 = vsub.f32 0.0, %v1533_v35  ;;  %v653_v21 = vand.u32 2147483647, %v1536_v25  ;;  %v654_v52 = vand.u32 2147483647, %v639_v58  ;;  %v648_v59 = vmin.f32 %v1536_v25, 0.0 }
  0x6e   :  { %v655_v17 = vand.u32 2147483647, %v640_v20  ;;  %v656_v37 = vand.u32 2147483647, %v641_v14  ;;  %v649_v13 = vmin.f32 %v639_v58, 0.0  ;;  %v650_v40 = vmin.f32 %v640_v20, 0.0 }
  0x6f   :  { %v657_v41 = vand.u32 2147483647, %v642_v26  ;;  %v658_v48 = vsub.f32 0.0, %v653_v21  ;;  %v659_v29 = vsub.f32 0.0, %v654_v52  ;;  %v651_v20 = vmin.f32 %v641_v14, 0.0 }
  0x70   :  { %v660_v32 = vsub.f32 0.0, %v655_v17  ;;  %v661_v56 = vsub.f32 0.0, %v656_v37 }
  0x71   :  { %v662_v57 = vsub.f32 0.0, %v657_v41  ;;  %v663_v30 = vmul.f32 1.442695, %v658_v48  ;;  %v665_v28 = vmul.f32 1.442695, %v659_v29  ;;  %v652_v29 = vmin.f32 %v642_v26, 0.0 }
  0x72   :  { %v667_v24 = vmul.f32 1.442695, %v660_v32  ;;  %v669_v27 = vmul.f32 1.442695, %v661_v56 }
  0x73   :  { %860 = vpow2.f32 %v663_v30  ;;  %v671_v15 = vmul.f32 1.442695, %v662_v57 }
  0x74   :  { %862 = vpow2.f32 %v665_v28 }
  0x75   :  { %864 = vpow2.f32 %v667_v24 }
  0x76   :  { %866 = vpow2.f32 %v669_v27 }
  0x77   :  { %868 = vpow2.f32 %v671_v15 }
  0x79   :  { %v861_v36 = vpop.eup %860 }
  0x7a   :  { %v863_v38 = vpop.eup %862  ;;  %v673_v53 = vadd.f32 1.0, %v861_v36  ;;  %v676_v54 = vmul.f32 -0.5, %v861_v36  ;;  %v679_v34 = vand.u32 2147483647, %v861_v36 }
  0x7b   :  { %v865_v45 = vpop.eup %864  ;;  %v682_v49 = vadd.f32 1.0, %v863_v38  ;;  %v685_v31 = vmul.f32 -0.5, %v863_v38  ;;  %v688_v18 = vand.u32 2147483647, %v863_v38 }
  0x7c   :  { %v867_v9 = vpop.eup %866  ;;  %870 = vlog2.f32 %v673_v53  ;;  %v691_v4 = vadd.f32 1.0, %v865_v45  ;;  %v677_v16 = vadd.f32 1.0, %v676_v54  ;;  %v694_v50 = vmul.f32 -0.5, %v865_v45 }
  0x7d   :  { %v869_v7 = vpop.eup %868  ;;  %872 = vlog2.f32 %v682_v49  ;;  %v686_v51 = vadd.f32 1.0, %v685_v31  ;;  %v700_v2 = vadd.f32 1.0, %v867_v9  ;;  %v703_v43 = vmul.f32 -0.5, %v867_v9 }
  0x7e   :  { %874 = vlog2.f32 %v691_v4  ;;  %v695_v8 = vadd.f32 1.0, %v694_v50  ;;  %v697_v1 = vand.u32 2147483647, %v865_v45  ;;  %v709_v22 = vadd.f32 1.0, %v869_v7 }
  0x7f   :  { %876 = vlog2.f32 %v700_v2  ;;  %v712_v10 = vmul.f32 -0.5, %v869_v7  ;;  %v678_v19 = vmul.f32 %v861_v36, %v677_v16  ;;  %v704_v23 = vadd.f32 1.0, %v703_v43 }
  0x80   :  { %vm1545_vm2 = vcmp.lt.f32.partialorder %v679_v34, 0.0004427343  ;;  %v687_v12 = vmul.f32 %v863_v38, %v686_v51  ;;  %v706_v0 = vand.u32 2147483647, %v867_v9  ;;  %878 = vlog2.f32 %v709_v22 }
  0x81   :  { %vm1549_vm3 = vcmp.lt.f32.partialorder %v688_v18, 0.0004427343  ;;  %v696_v3 = vmul.f32 %v865_v45, %v695_v8  ;;  %v713_v11 = vadd.f32 1.0, %v712_v10  ;;  %vm1553_vm4 = vcmp.lt.f32.partialorder %v697_v1, 0.0004427343 }
  0x82   :  { %v871_v39 = vpop.eup %870  ;;  %v715_v61 = vand.u32 2147483647, %v869_v7  ;;  %v705_v62 = vmul.f32 %v867_v9, %v704_v23  ;;  %vm707_vm5 = vcmp.lt.f32.partialorder %v706_v0, 0.0004427343 }
  0x83   :  { %v873_v33 = vpop.eup %872  ;;  %v675_v5 = vmul.f32 0.6931472, %v871_v39  ;;  %v714_v37 = vmul.f32 %v869_v7, %v713_v11 }
  0x84   :  { %v875_v46 = vpop.eup %874  ;;  %v684_v44 = vmul.f32 0.6931472, %v873_v33  ;;  %vm716_vm6 = vcmp.lt.f32.partialorder %v715_v61, 0.0004427343 }
  0x85   :  { %v681_v42 = vsel %vm1545_vm2, %v678_v19, %v675_v5  ;;  %v693_v47 = vmul.f32 0.6931472, %v875_v46  ;;  %v877_v58 = vpop.eup %876 }
  0x86   :  { %v690_v25 = vsel %vm1549_vm3, %v687_v12, %v684_v44  ;;  %v718_v21 = vsub.f32 %v648_v59, %v681_v42  ;;  %v702_v17 = vmul.f32 0.6931472, %v877_v58  ;;  %v879_v48 = vpop.eup %878 }
  0x87   :  { %v699_v52 = vsel %vm1553_vm4, %v696_v3, %v693_v47  ;;  %v719_v41 = vsub.f32 %v649_v13, %v690_v25  ;;  %v711_v60 = vmul.f32 0.6931472, %v879_v48 }
  0x88   :  { %v720_v32 = vsub.f32 %v650_v40, %v699_v52  ;;  %v708_v56 = vsel %vm707_vm5, %v705_v62, %v702_v17 }
  0x89   :  { %v723_v14 = vadd.f32 %v719_v41, %v718_v21  ;;  %v721_v57 = vsub.f32 %v651_v20, %v708_v56  ;;  %v717_v30 = vsel %vm716_vm6, %v714_v37, %v711_v60 }
  0x8a   :  { %v722_v24 = vsub.f32 %v652_v29, %v717_v30 }
  0x8b   :  { %v724_v28 = vadd.f32 %v723_v14, %v720_v32 }
  0x8c   :  { %v726_v15 = vsel %vm144_vm0, %v722_v24, 0.0 }
  0x8d   :  { %v725_v27 = vadd.f32 %v724_v28, %v721_v57 }
  0x8f   :  { %v727_v36 = vadd.f32 %v726_v15, %v725_v27 }
  0x91   :  { %v728_v38 = vrot.slane %v727_v36, 4 }
  0x93   :  { %v729_v53 = vadd.f32 %v728_v38, %v727_v36 }
  0x95   :  { %v730_v54 = vrot.slane %v729_v53, 2 }
  0x97   :  { %v731_v45 = vadd.f32 %v730_v54, %v729_v53 }
  0x99   :  { %v732_v49 = vrot.slane %v731_v45, 1 }
  0x9b   :  { %v733_v35 = vadd.f32 %v732_v49, %v731_v45 }
  0x9d   :  { %v734_v26 = vsub.f32 0.0, %v733_v35 }
  0x9f   :  { %735 = vst [vmem:[%s1573_s2] sm:$0x1] %v734_v26 }

</bundles_post_ra>
